<compile_context>
chip_gen: v7x
topology: tpu7x:2x2x1
jax: 0.10.0
libtpu: 0.0.40
codegen_flags: <defaults>
</compile_context>

<pallas_src>
import functools

import jax
import jax.numpy as jnp
from jax import lax
from jax.experimental import pallas as pl
from jax.experimental.pallas import tpu as pltpu


# ----------------------------------------------------------------------------
# One-time calibration of the rotate direction used by pltpu.roll, so the 3x3
# stencil taps always pair with the right conv weights.
# ----------------------------------------------------------------------------
def _roll_probe_kernel(x_ref, o_ref):
    o_ref[...] = pltpu.roll(x_ref[...], 1, axis=1)


@functools.lru_cache(maxsize=1)
def _roll_matches_numpy() -> bool:
    """True if pltpu.roll follows np.roll semantics (out[i] = x[(i - shift) % n])."""
    x = jnp.tile(jnp.arange(128, dtype=jnp.float32)[None, :], (8, 1))
    y = pl.pallas_call(
        _roll_probe_kernel,
        out_shape=jax.ShapeDtypeStruct((8, 128), jnp.float32),
    )(x)
    return bool(jax.device_get(y)[0, 0] == 127.0)


# ----------------------------------------------------------------------------
# Fused kernel
# ----------------------------------------------------------------------------
def trans_guide_kernel(xcol_ref, w1_ref, b1_ref, wsa_ref, w2_ref, b2_ref,
                       mask_ref, o_ref, *, width, np_roll):
    # xcol_ref : (54, L)      im2col of zero-padded input (row = tap*6 + cin)
    # w1_ref   : (CH, 54)     conv1 weight (same row order)
    # b1_ref   : (CH, 1)      conv1 bias (lane-broadcast)
    # wsa_ref  : (2, 9) SMEM  spatial-attention weights [channel(avg,max), tap]
    # w2_ref   : (3, 9*CH)    conv2 weight (row = tap*CH + cin)
    # b2_ref   : (3, 1)       conv2 bias
    # mask_ref : (9, L)       {0,1} out-of-image masks per tap
    # o_ref    : (3, L)       lane-dense output block, L = Bt*H*W
    L = o_ref.shape[-1]

    # ---- conv1 (6 -> CH, 3x3): a single MXU matmul --------------------------
    y1 = jnp.dot(w1_ref[...], xcol_ref[...],
                 preferred_element_type=jnp.float32) + b1_ref[...]      # (CH, L)
    # nn.LeakyReLU(True): negative_slope=True == 1.0 -> identity, intentionally
    # omitted.  TODO(synk): if the author meant inplace=True (slope 0.01), use
    # jnp.where(y1 >= 0, y1, 0.01 * y1) here (and in the reference).

    masks = mask_ref[...]                                               # (9, L)

    def shift(x, off):
        """shifted[:, p] = x[:, p + off] (wrapped lanes are zeroed by the masks)."""
        if off == 0:
            return x
        amt = (-off) % L if np_roll else off % L
        return pltpu.roll(x, amt, axis=1)

    offs = [(dh - 1) * width + (dw - 1) for dh in range(3) for dw in range(3)]

    # ---- SpatialAttention(3): channel stats + 3x3 conv on the VPU -----------
    avg = jnp.mean(y1, axis=0, keepdims=True)                           # (1, L)
    mx = jnp.max(y1, axis=0, keepdims=True)                             # (1, L)

    acc_sa = jnp.zeros_like(avg)
    for t, off in enumerate(offs):
        a_sh, m_sh = shift(avg, off), shift(mx, off)
        if off != 0:
            m = masks[t:t + 1, :]
            a_sh, m_sh = a_sh * m, m_sh * m
        acc_sa = acc_sa + wsa_ref[0, t] * a_sh + wsa_ref[1, t] * m_sh
    y_sa = jax.nn.sigmoid(acc_sa) * y1                                  # (CH, L)

    # ---- conv2 (CH -> 3, 3x3): stack taps, one MXU matmul --------------------
    parts = []
    for t, off in enumerate(offs):
        y_sh = shift(y_sa, off)
        if off != 0:
            y_sh = y_sh * masks[t:t + 1, :]
        parts.append(y_sh)
    y_stack = jnp.concatenate(parts, axis=0)                            # (9*CH, L)

    out = jnp.dot(w2_ref[...], y_stack,
                  preferred_element_type=jnp.float32) + b2_ref[...]     # (3, L)
    o_ref[...] = out.astype(o_ref.dtype)


# ----------------------------------------------------------------------------
# Wrapper
# ----------------------------------------------------------------------------
def _pick_block_batch(n, hw, max_lanes=4096):
    """Largest divisor of n whose lane footprint (bt*hw) is 128-aligned and small."""
    if hw % 128 != 0:
        return n  # single full-extent block is always legal
    best = 1
    for d in range(1, n + 1):
        if n % d == 0 and d * hw <= max_lanes:
            best = d
    return best


@functools.partial(jax.jit, static_argnames=("np_roll",))
def _trans_guide_forward(x_nchw, w1, b1, wsa, w2, b2, *, np_roll):
    N, C, H, W = x_nchw.shape
    CH = w1.shape[0]
    HW = H * W
    assert C == 6 and wsa.shape == (1, 2, 3, 3)

    Bt = _pick_block_batch(N, HW)
    L = Bt * HW

    # ---- wrapper-side glue (layout plumbing only) ----------------------------
    # im2col of the zero-padded input: row = tap*6 + cin, col = n*HW + h*W + w.
    xp = jnp.pad(x_nchw, ((0, 0), (0, 0), (1, 1), (1, 1)))
    wins = [xp[:, :, dh:dh + H, dw:dw + W] for dh in range(3) for dw in range(3)]
    xcol = jnp.stack(wins, axis=0).transpose(0, 2, 1, 3, 4).reshape(9 * C, N * HW)

    # weights -> matmul layouts matching the row orders above (PyTorch OIHW in)
    w1_mat = jnp.transpose(w1, (0, 2, 3, 1)).reshape(CH, 9 * C)      # (CH, 54)
    w2_mat = jnp.transpose(w2, (0, 2, 3, 1)).reshape(3, 9 * CH)      # (3, 9*CH)
    wsa_mat = wsa[0].reshape(2, 9)                                   # [chan, tap]
    b1_col = b1.reshape(CH, 1)
    b2_col = b2.reshape(3, 1)

    # {0,1} boundary masks per tap, tiled over the Bt images of a block
    hh = jnp.arange(H)
    ww = jnp.arange(W)
    m_list = []
    for dh in range(3):
        mh = ((hh + dh - 1 >= 0) & (hh + dh - 1 < H)).astype(jnp.float32)
        for dw in range(3):
            mw = ((ww + dw - 1 >= 0) & (ww + dw - 1 < W)).astype(jnp.float32)
            m_list.append(jnp.outer(mh, mw).reshape(HW))
    mask_arr = jnp.tile(jnp.stack(m_list, axis=0), (1, Bt))          # (9, L)

    kernel = functools.partial(trans_guide_kernel, width=W, np_roll=np_roll)

    out_flat = pl.pallas_call(
        kernel,
        out_shape=jax.ShapeDtypeStruct((3, N * HW), jnp.float32),
        grid=(N // Bt,),
        in_specs=[
            pl.BlockSpec((9 * C, L), lambda i: (0, i)),
            pl.BlockSpec((CH, 9 * C), lambda i: (0, 0)),
            pl.BlockSpec((CH, 1), lambda i: (0, 0)),
            pl.BlockSpec(memory_space=pltpu.MemorySpace.SMEM),
            pl.BlockSpec((3, 9 * CH), lambda i: (0, 0)),
            pl.BlockSpec((3, 1), lambda i: (0, 0)),
            pl.BlockSpec((9, L), lambda i: (0, 0)),
        ],
        out_specs=pl.BlockSpec((3, L), lambda i: (0, i)),
        compiler_params=pltpu.CompilerParams(
            dimension_semantics=("parallel",)),
    )(xcol, w1_mat, b1_col, wsa_mat, w2_mat, b2_col, mask_arr)

    # (3, N*HW) -> (N, 3, H, W)
    return out_flat.reshape(3, N, H, W).transpose(1, 0, 2, 3)


def trans_guide_pallas(x_nchw, w1, b1, wsa, w2, b2):
    """x_nchw: (N, 6, H, W) f32; weights in PyTorch OIHW layout. Returns (N, 3, H, W)."""
    return _trans_guide_forward(x_nchw, w1, b1, wsa, w2, b2,
                                np_roll=_roll_matches_numpy())


# ----------------------------------------------------------------------------
# Pure-JAX reference (mirrors the PyTorch module, NCHW)
# ----------------------------------------------------------------------------
def trans_guide_ref(x, w1, b1, wsa, w2, b2):
    dn = ("NCHW", "OIHW", "NCHW")
    y = lax.conv_general_dilated(x, w1, (1, 1), "SAME", dimension_numbers=dn)
    y = y + b1[None, :, None, None]
    # LeakyReLU(negative_slope=True == 1.0) is the identity.
    avg = jnp.mean(y, axis=1, keepdims=True)
    mx = jnp.max(y, axis=1, keepdims=True)
    att = jnp.concatenate([avg, mx], axis=1)
    att = lax.conv_general_dilated(att, wsa, (1, 1), "SAME", dimension_numbers=dn)
    y = jax.nn.sigmoid(att) * y
    out = lax.conv_general_dilated(y, w2, (1, 1), "SAME", dimension_numbers=dn)
    return out + b2[None, :, None, None]


if __name__ == "__main__":
    key = jax.random.PRNGKey(0)
    kx, k1, k2, k3, k4, k5 = jax.random.split(key, 6)

    N, H, W = 2, 16, 16
    CH = 16

    x = jax.random.normal(kx, (N, 6, H, W), jnp.float32)
    # PyTorch OIHW-convention parameters.
    w1 = 0.1 * jax.random.normal(k1, (CH, 6, 3, 3), jnp.float32)
    b1 = 0.1 * jax.random.normal(k2, (CH,), jnp.float32)
    wsa = 0.1 * jax.random.normal(k3, (1, 2, 3, 3), jnp.float32)
    w2 = 0.1 * jax.random.normal(k4, (3, CH, 3, 3), jnp.float32)
    b2 = 0.1 * jax.random.normal(k5, (3,), jnp.float32)

    out = jax.block_until_ready(trans_guide_pallas(x, w1, b1, wsa, w2, b2))
    ref = jax.block_until_ready(trans_guide_ref(x, w1, b1, wsa, w2, b2))

    assert out.shape == (N, 3, H, W)
    max_err = float(jnp.max(jnp.abs(out - ref)))
    assert jnp.allclose(out, ref, rtol=1e-4, atol=1e-4), max_err
    print("KERNEL_OK")
</pallas_src>

<mosaic_0001>
module attributes {stable_mosaic.version = 11 : i64} {
  func.func @_roll_probe_kernel(%arg0: memref<8x128xf32, #tpu.memory_space<vmem>>, %arg1: memref<8x128xf32, #tpu.memory_space<vmem>>) attributes {dimension_semantics = [], scalar_prefetch = 0 : i64, scratch_operands = 0 : i64, tpu.core_type = #tpu.core_type<tc>} {
    %c0 = arith.constant 0 : index
    %c0_0 = arith.constant 0 : index
    %0 = vector.load %arg0[%c0, %c0_0] : memref<8x128xf32, #tpu.memory_space<vmem>>, vector<8x128xf32>
    %c1_i32 = arith.constant 1 : i32
    %1 = tpu.dynamic_rotate %0 by %c1_i32 dim 1 : vector<8x128xf32>, i32 -> vector<8x128xf32>
    %c0_1 = arith.constant 0 : index
    %c0_2 = arith.constant 0 : index
    %2 = vector.load %arg1[%c0_1, %c0_2] : memref<8x128xf32, #tpu.memory_space<vmem>>, vector<8x128xf32>
    tpu.vector_store %arg1[%c0_1, %c0_2], %1 {strides = array<i32>} : memref<8x128xf32, #tpu.memory_space<vmem>>, vector<8x128xf32>,
    return
  }
}

</mosaic_0001>

<bundles_post_ra>
// kernel: tpu_custom_call.1
= control target key start
LH: loop header
LB: loop body
LE: loop exit
PB: predicated region body
PF: predicated region fallthrough
CT: control target
= control target key end

     0   :  { %6 = vsyncpa [#allocation3], 0  ;;  %s128_s0 = inlined_call_operand.hbm [shape: f32[8,128], index: 0, kind: input, shape index: {}]   ;;  %s129_s1 = inlined_call_operand.hbm [shape: f32[8,128], index: 1, kind: output, shape index: {}]  }
   0x1   :  { %7 = vsyncpa [#allocation4], 0  ;;  %s91_s6 = smov [#allocation2]   ;;  %s43_s10 = scalar_lea.hbm %s128_s0, 128 }
   0x2   :  { %s14_s7 = sshll.u32 %s91_s6, 4  ;;  %p44_p0 = scmp.ne.s32.totalorder %s128_s0, %s43_s10  ;;  %s15_s7 = int_to_ptr.vmem [resolvable:$true] %s14_s7 }
   0x3   :  { %p47_p1 = scmp.lt.u32.totalorder %s43_s10, %s128_s0 }
   0x5   :  { %p49_p2 = pnand %p47_p1, %p44_p0 }
   0x7   :  { %52 = shalt.err (!%p49_p2)
}
   0x8   :  { %s53_s15 = scalar_lea.vmem %s15_s7, 128  ;;  %p58_p4 = scmp.lt.s32.totalorder %s15_s7, %s15_s7 }
   0x9   :  { %p54_p3 = scmp.ne.s32.totalorder %s15_s7, %s53_s15  ;;  %p59_p5 = scmp.lt.s32.totalorder %s53_s15, %s53_s15 }
   0xb   :  { %p60_p6 = por %p59_p5, %p58_p4 }
   0xd   :  { %p61_p7 = pnand %p60_p6, %p54_p3 }
   0xf   :  { %64 = shalt.err (!%p61_p7)
}
  0x10   :  { %17 = dma.hbm_to_vmem [thread:$0]  %s128_s0, 128, %s15_s7, [#allocation3]  }
  0x11   :  { %87 = dma.done.wait [#allocation3], 128  }
  0x12   :  { %88 = vsyncadd [#allocation3], 4294967168  ;;  %v21_v0 = vld [vmem:[#allocation2] sm:$0xff]  ;;  %s92_s18 = smov 1   ;;  %s93_s19 = smov [#allocation5]  }
  0x13   :  { %22 = vrot.lane.b32.xlu0 %v21_v0, %s92_s18  ;;  %s31_s20 = sshll.u32 %s93_s19, 4  ;;  %s32_s20 = int_to_ptr.vmem [resolvable:$true] %s31_s20 }
  0x14   :  { %s65_s21 = scalar_lea.vmem %s32_s20, 128  ;;  %p70_p9 = scmp.lt.s32.totalorder %s32_s20, %s32_s20 }
  0x15   :  { %p66_p8 = scmp.ne.s32.totalorder %s32_s20, %s65_s21  ;;  %p71_p10 = scmp.lt.s32.totalorder %s65_s21, %s65_s21 }
  0x17   :  { %p72_p11 = por %p71_p10, %p70_p9 }
  0x19   :  { %p73_p12 = pnand %p72_p11, %p66_p8 }
  0x85   :  { %v23_v1 = vpop.permute.xlu0 %22 }
  0x86   :  { %24 = vst [vmem:[#allocation5] sm:$0xff] %v23_v1 }
  0x87   :  { %76 = shalt.err (!%p73_p12)
}
  0x88   :  { %s77_s0 = scalar_lea.hbm %s129_s1, 128 }
  0x89   :  { %p78_p13 = scmp.ne.s32.totalorder %s129_s1, %s77_s0  ;;  %p81_p0 = scmp.lt.u32.totalorder %s77_s0, %s129_s1 }
  0x8b   :  { %p83_p1 = pnand %p81_p0, %p78_p13 }
  0x8d   :  { %86 = shalt.err (!%p83_p1)
}
  0x8e   :  { %34 = dma.vmem_to_hbm [thread:$0]  %s32_s20, 128, %s129_s1, [#allocation4]  }
  0x8f   :  { %89 = dma.done.wait [#allocation4], 128  }
  0x90   :  { %90 = vsyncadd [#allocation4], 4294967168 }
  0x91   :  { %38 = vsyncpa [#allocation3], 1 }
  0x92   :  { %39 = vsyncpa [#allocation4], 1 }

</bundles_post_ra>
